<compile_context>
chip_gen: v7x
topology: tpu7x:2x2x1
jax: 0.10.0
libtpu: 0.0.40
codegen_flags: <defaults>
</compile_context>

<pallas_src>
import functools
import math

import jax
import jax.numpy as jnp
from jax.experimental import pallas as pl
from jax.experimental.pallas import tpu as pltpu


_CP1 = pltpu.CompilerParams(
    dimension_semantics=("parallel",),
    vmem_limit_bytes=48 * 1024 * 1024,
)


def _ceil_to(x, m):
    return (x + m - 1) // m * m


def _pick_tm(m, cap=512):
    """Largest-reasonable M tile (multiple of 16, <= cap, evenly split)."""
    if m <= cap:
        return m
    nb = -(-m // cap)
    return min(m, _ceil_to(-(-m // nb), 16))


# ----------------------------------------------------------------------------
# Fused matmul + bias + ReLU (optionally multi-headed outputs).
# Used for 1x1 convs, fused Inception branch heads and stride-2 im2col convs.
# ----------------------------------------------------------------------------
def _mm_heads_kernel(a_ref, w_ref, b_ref, *o_refs, relu):
    r = jnp.dot(a_ref[...], w_ref[...], preferred_element_type=jnp.float32)
    r = r + b_ref[...]
    if relu:
        r = jnp.maximum(r, 0.0)
    off = 0
    for o_ref in o_refs:
        c = o_ref.shape[1]
        o_ref[...] = r[:, off:off + c].astype(o_ref.dtype)
        off += c


def matmul_bias_act(a, w, b, out_widths=None, relu=True):
    """act(a @ w + b); optionally split the output along N into out_widths.

    a: (M, K), w: (K, N), b: (N,).  bf16 MXU inputs, f32 accumulation.
    Full-K / full-N blocks (weights are small), M tiled with a cdiv grid.
    """
    m, k = a.shape
    n_tot = w.shape[1]
    if out_widths is None:
        out_widths = (n_tot,)
    assert sum(out_widths) == n_tot
    tm = _pick_tm(m)
    grid = (pl.cdiv(m, tm),)
    out_shape = tuple(jax.ShapeDtypeStruct((m, c), jnp.bfloat16)
                      for c in out_widths)
    out_specs = tuple(pl.BlockSpec((tm, c), lambda i: (i, 0))
                      for c in out_widths)
    res = pl.pallas_call(
        functools.partial(_mm_heads_kernel, relu=relu),
        out_shape=out_shape,
        grid=grid,
        in_specs=[
            pl.BlockSpec((tm, k), lambda i: (i, 0)),
            pl.BlockSpec((k, n_tot), lambda i: (0, 0)),
            pl.BlockSpec((1, n_tot), lambda i: (0, 0)),
        ],
        out_specs=out_specs,
        compiler_params=_CP1,
    )(a.astype(jnp.bfloat16), w.astype(jnp.bfloat16),
      b.reshape(1, n_tot).astype(jnp.float32))
    return list(res)


# ----------------------------------------------------------------------------
# Direct (fused) stride-1 convolution: conv -> BN (folded) -> ReLU.
# The image is padded into a VMEM scratch; no im2col matrix ever hits HBM.
# ----------------------------------------------------------------------------
def _conv_kernel(x_ref, w_ref, b_ref, o_ref, xs_ref, *, kh, kw, ph, pw, relu):
    h, w, cin = x_ref.shape[1], x_ref.shape[2], x_ref.shape[3]
    ho, wo, cout = o_ref.shape[1], o_ref.shape[2], o_ref.shape[3]
    wo_al = xs_ref.shape[1] - (kw - 1)            # 16-aligned output width

    if ph or pw or (wo_al != wo):                 # static condition
        xs_ref[...] = jnp.zeros_like(xs_ref)      # zero halo / alignment pad
    xs_ref[ph:ph + h, pw:pw + w, :] = x_ref[0]    # place image interior

    acc = None
    for i in range(kh):
        for j in range(kw):
            # aligned window -> layout no-op collapse -> MXU matmul
            a2 = xs_ref[i:i + ho, j:j + wo_al, :].reshape(ho * wo_al, cin)
            t = jnp.dot(a2, w_ref[i * kw + j],
                        preferred_element_type=jnp.float32)
            acc = t if acc is None else acc + t

    r = acc + b_ref[...]
    if relu:
        r = jnp.maximum(r, 0.0)
    r = r.reshape(ho, wo_al, cout)[:, :wo, :]     # aligned split + crop
    o_ref[0] = r.astype(o_ref.dtype)


def _conv_direct(x, w2, bias, kh, kw, ph, pw):
    n, h, w, cin = x.shape
    cout = w2.shape[-1]
    ho = h + 2 * ph - kh + 1
    wo = w + 2 * pw - kw + 1
    wo_al = _ceil_to(wo, 16)
    hs, ws = h + 2 * ph, wo_al + kw - 1
    return pl.pallas_call(
        functools.partial(_conv_kernel, kh=kh, kw=kw, ph=ph, pw=pw, relu=True),
        out_shape=jax.ShapeDtypeStruct((n, ho, wo, cout), jnp.bfloat16),
        grid=(n,),
        in_specs=[
            pl.BlockSpec((1, h, w, cin), lambda i: (i, 0, 0, 0)),
            pl.BlockSpec((kh * kw, cin, cout), lambda i: (0, 0, 0)),
            pl.BlockSpec((1, cout), lambda i: (0, 0)),
        ],
        out_specs=pl.BlockSpec((1, ho, wo, cout), lambda i: (i, 0, 0, 0)),
        scratch_shapes=[pltpu.VMEM((hs, ws, cin), jnp.bfloat16)],
        compiler_params=_CP1,
    )(x.astype(jnp.bfloat16),
      w2.reshape(kh * kw, cin, cout).astype(jnp.bfloat16),
      bias.reshape(1, cout).astype(jnp.float32))


def conv2d_bn_relu(x, p, stride=(1, 1), padding=(0, 0)):
    """BasicConv2d: conv -> BN(eps=1e-3, eval, folded) -> ReLU."""
    w, scale, bias = p["w"], p["scale"], p["bias"]
    kh, kw, cin, cout = w.shape
    sh, sw = stride
    ph, pw = padding
    n, h, wd, _ = x.shape
    w2 = w * scale[None, None, None, :]
    if (kh, kw, sh, sw, ph, pw) == (1, 1, 1, 1, 0, 0):
        out = matmul_bias_act(x.reshape(n * h * wd, cin),
                              w2.reshape(cin, cout), bias)[0]
        return out.reshape(n, h, wd, cout)
    if (sh, sw) == (1, 1):
        return _conv_direct(x, w2, bias, kh, kw, ph, pw)
    # Stride-2 convolutions (all un-padded in InceptionV3): im2col + matmul.
    # TODO(synk): fuse the strided patch gather into the matmul kernel too.
    ho = (h + 2 * ph - kh) // sh + 1
    wo = (wd + 2 * pw - kw) // sw + 1
    xp = x if (ph == 0 and pw == 0) else jnp.pad(
        x, ((0, 0), (ph, ph), (pw, pw), (0, 0)))
    patches = [xp[:, i:i + (ho - 1) * sh + 1:sh, j:j + (wo - 1) * sw + 1:sw, :]
               for i in range(kh) for j in range(kw)]
    a = jnp.concatenate(patches, axis=-1).reshape(n * ho * wo, kh * kw * cin)
    out = matmul_bias_act(a, w2.reshape(kh * kw * cin, cout), bias)[0]
    return out.reshape(n, ho, wo, cout)


def basic_conv(x, p, stride=(1, 1), padding=(0, 0)):
    return conv2d_bn_relu(x, p, stride, padding)


def conv1x1_heads(x, plist, relu=True):
    """Fused parallel 1x1 BasicConv2d branches sharing the same input."""
    n, h, w, cin = x.shape
    ws, bs, widths = [], [], []
    for p in plist:
        cout = p["w"].shape[-1]
        ws.append((p["w"] * p["scale"]).reshape(cin, cout))
        bs.append(p["bias"])
        widths.append(cout)
    w_all = jnp.concatenate(ws, axis=1)
    b_all = jnp.concatenate(bs, axis=0)
    outs = matmul_bias_act(x.reshape(n * h * w, cin), w_all, b_all,
                           out_widths=tuple(widths), relu=relu)
    return [o.reshape(n, h, w, c) for o, c in zip(outs, widths)]


# ----------------------------------------------------------------------------
# Pooling kernels
# ----------------------------------------------------------------------------
def _maxpool3x3_s2_kernel(x_ref, o_ref):
    x = x_ref[0]                                     # (Hp, W, C)
    ho, wt, c = o_ref.shape[1], o_ref.shape[2], o_ref.shape[3]
    # 3-tap max along W (stride 1)
    t = jnp.maximum(jnp.maximum(x[:, 0:wt, :], x[:, 1:1 + wt, :]),
                    x[:, 2:2 + wt, :])
    # 3-tap max along H at stride 2 (leading-dim reshape phase-select)
    def rows(i):
        return t[i:i + 2 * ho].reshape(ho, 2, wt, c)[:, 0]
    o_ref[0] = jnp.maximum(jnp.maximum(rows(0), rows(1)), rows(2))


def max_pool3x3_s2(x):
    """nn.MaxPool2d(kernel_size=3, stride=2) (valid)."""
    n, h, w, c = x.shape
    ho = (h - 3) // 2 + 1
    wt = w - 2
    hp = max(h, 2 * ho + 2)
    if hp > h:                                       # pad rows never selected
        x = jnp.pad(x, ((0, 0), (0, hp - h), (0, 0), (0, 0)))
    y = pl.pallas_call(
        _maxpool3x3_s2_kernel,
        out_shape=jax.ShapeDtypeStruct((n, ho, wt, c), x.dtype),
        grid=(n,),
        in_specs=[pl.BlockSpec((1, hp, w, c), lambda i: (i, 0, 0, 0))],
        out_specs=pl.BlockSpec((1, ho, wt, c), lambda i: (i, 0, 0, 0)),
        compiler_params=_CP1,
    )(x)
    # TODO(synk): fold the W-direction stride-2 selection into the kernel too.
    return y[:, :, ::2, :]


def _avgpool3x3_s1_kernel(x_ref, o_ref):
    x = x_ref[0].astype(jnp.float32)                 # (H+2, W+2, C)
    h, w = o_ref.shape[1], o_ref.shape[2]
    t = x[:, 0:w, :] + x[:, 1:1 + w, :] + x[:, 2:2 + w, :]
    s = t[0:h, :, :] + t[1:1 + h, :, :] + t[2:2 + h, :, :]
    o_ref[0] = (s * (1.0 / 9.0)).astype(o_ref.dtype)


def avg_pool3x3_s1_p1(x):
    """F.avg_pool2d(x, 3, stride=1, padding=1), count_include_pad=True."""
    n, h, w, c = x.shape
    xp = jnp.pad(x, ((0, 0), (1, 1), (1, 1), (0, 0)))
    return pl.pallas_call(
        _avgpool3x3_s1_kernel,
        out_shape=jax.ShapeDtypeStruct((n, h, w, c), x.dtype),
        grid=(n,),
        in_specs=[pl.BlockSpec((1, h + 2, w + 2, c), lambda i: (i, 0, 0, 0))],
        out_specs=pl.BlockSpec((1, h, w, c), lambda i: (i, 0, 0, 0)),
        compiler_params=_CP1,
    )(xp)


def _gap_kernel(x_ref, o_ref):
    x = x_ref[0].astype(jnp.float32)                 # (H, W, C)
    s = jnp.sum(jnp.sum(x, axis=0), axis=0, keepdims=True)
    o_ref[0] = s * (1.0 / (x.shape[0] * x.shape[1]))


def global_avg_pool(x):
    """nn.AdaptiveAvgPool2d((1,1)) followed by view(N, -1)."""
    n, h, w, c = x.shape
    y = pl.pallas_call(
        _gap_kernel,
        out_shape=jax.ShapeDtypeStruct((n, 1, c), jnp.float32),
        grid=(n,),
        in_specs=[pl.BlockSpec((1, h, w, c), lambda i: (i, 0, 0, 0))],
        out_specs=pl.BlockSpec((1, 1, c), lambda i: (i, 0, 0)),
        compiler_params=_CP1,
    )(x)
    return y.reshape(n, c)


# ----------------------------------------------------------------------------
# Deterministic synthetic parameters (shapes follow torchvision inception_v3)
# ----------------------------------------------------------------------------
_ROOT_KEY = jax.random.PRNGKey(0)
_LAYER_IDX = [0]


def make_basic_conv(cin, cout, kh, kw):
    idx = _LAYER_IDX[0]
    _LAYER_IDX[0] += 1
    k = jax.random.fold_in(_ROOT_KEY, idx)
    kw_, kg, kb, km, kv = jax.random.split(k, 5)
    fan_in = kh * kw * cin
    w = jax.random.normal(kw_, (kh, kw, cin, cout), jnp.float32) * math.sqrt(2.0 / fan_in)
    gamma = 1.0 + 0.1 * jax.random.normal(kg, (cout,), jnp.float32)
    beta = 0.05 * jax.random.normal(kb, (cout,), jnp.float32)
    mean = 0.05 * jax.random.normal(km, (cout,), jnp.float32)
    var = 1.0 + 0.1 * jax.random.uniform(kv, (cout,), jnp.float32)
    scale = gamma / jnp.sqrt(var + 1e-3)          # BN eps = 0.001 (eval mode)
    bias = beta - mean * scale
    return dict(w=w, scale=scale, bias=bias)


def make_inception_a(cin, pool_features):
    return dict(
        b1=make_basic_conv(cin, 64, 1, 1),
        b5_1=make_basic_conv(cin, 48, 1, 1), b5_2=make_basic_conv(48, 64, 5, 5),
        bd_1=make_basic_conv(cin, 64, 1, 1), bd_2=make_basic_conv(64, 96, 3, 3),
        bd_3=make_basic_conv(96, 96, 3, 3),
        bp=make_basic_conv(cin, pool_features, 1, 1))


def inception_a(x, p):
    b1, b5, bd = conv1x1_heads(x, [p["b1"], p["b5_1"], p["bd_1"]])
    b5 = basic_conv(b5, p["b5_2"], padding=(2, 2))
    bd = basic_conv(bd, p["bd_2"], padding=(1, 1))
    bd = basic_conv(bd, p["bd_3"], padding=(1, 1))
    bp = basic_conv(avg_pool3x3_s1_p1(x), p["bp"])
    return jnp.concatenate([b1, b5, bd, bp], axis=-1)


def make_inception_b(cin):
    return dict(
        b3=make_basic_conv(cin, 384, 3, 3),
        bd_1=make_basic_conv(cin, 64, 1, 1),
        bd_2=make_basic_conv(64, 96, 3, 3),
        bd_3=make_basic_conv(96, 96, 3, 3))


def inception_b(x, p):
    b3 = basic_conv(x, p["b3"], stride=(2, 2))
    bd = basic_conv(x, p["bd_1"])
    bd = basic_conv(bd, p["bd_2"], padding=(1, 1))
    bd = basic_conv(bd, p["bd_3"], stride=(2, 2))
    bp = max_pool3x3_s2(x)
    return jnp.concatenate([b3, bd, bp], axis=-1)


def make_inception_c(cin, c7):
    return dict(
        b1=make_basic_conv(cin, 192, 1, 1),
        b7_1=make_basic_conv(cin, c7, 1, 1),
        b7_2=make_basic_conv(c7, c7, 1, 7),
        b7_3=make_basic_conv(c7, 192, 7, 1),
        bd_1=make_basic_conv(cin, c7, 1, 1),
        bd_2=make_basic_conv(c7, c7, 7, 1),
        bd_3=make_basic_conv(c7, c7, 1, 7),
        bd_4=make_basic_conv(c7, c7, 7, 1),
        bd_5=make_basic_conv(c7, 192, 1, 7),
        bp=make_basic_conv(cin, 192, 1, 1))


def inception_c(x, p):
    b1, b7, bd = conv1x1_heads(x, [p["b1"], p["b7_1"], p["bd_1"]])
    b7 = basic_conv(b7, p["b7_2"], padding=(0, 3))
    b7 = basic_conv(b7, p["b7_3"], padding=(3, 0))
    bd = basic_conv(bd, p["bd_2"], padding=(3, 0))
    bd = basic_conv(bd, p["bd_3"], padding=(0, 3))
    bd = basic_conv(bd, p["bd_4"], padding=(3, 0))
    bd = basic_conv(bd, p["bd_5"], padding=(0, 3))
    bp = basic_conv(avg_pool3x3_s1_p1(x), p["bp"])
    return jnp.concatenate([b1, b7, bd, bp], axis=-1)


def make_inception_d(cin):
    return dict(
        b3_1=make_basic_conv(cin, 192, 1, 1), b3_2=make_basic_conv(192, 320, 3, 3),
        b7_1=make_basic_conv(cin, 192, 1, 1), b7_2=make_basic_conv(192, 192, 1, 7),
        b7_3=make_basic_conv(192, 192, 7, 1), b7_4=make_basic_conv(192, 192, 3, 3))


def inception_d(x, p):
    b3, b7 = conv1x1_heads(x, [p["b3_1"], p["b7_1"]])
    b3 = basic_conv(b3, p["b3_2"], stride=(2, 2))
    b7 = basic_conv(b7, p["b7_2"], padding=(0, 3))
    b7 = basic_conv(b7, p["b7_3"], padding=(3, 0))
    b7 = basic_conv(b7, p["b7_4"], stride=(2, 2))
    bp = max_pool3x3_s2(x)
    return jnp.concatenate([b3, b7, bp], axis=-1)


def make_inception_e(cin):
    return dict(
        b1=make_basic_conv(cin, 320, 1, 1),
        b3_1=make_basic_conv(cin, 384, 1, 1),
        b3_2a=make_basic_conv(384, 384, 1, 3),
        b3_2b=make_basic_conv(384, 384, 3, 1),
        bd_1=make_basic_conv(cin, 448, 1, 1),
        bd_2=make_basic_conv(448, 384, 3, 3),
        bd_3a=make_basic_conv(384, 384, 1, 3),
        bd_3b=make_basic_conv(384, 384, 3, 1),
        bp=make_basic_conv(cin, 192, 1, 1))


def inception_e(x, p):
    b1, b3, bd = conv1x1_heads(x, [p["b1"], p["b3_1"], p["bd_1"]])
    b3 = jnp.concatenate([basic_conv(b3, p["b3_2a"], padding=(0, 1)),
                          basic_conv(b3, p["b3_2b"], padding=(1, 0))], axis=-1)
    bd = basic_conv(bd, p["bd_2"], padding=(1, 1))
    bd = jnp.concatenate([basic_conv(bd, p["bd_3a"], padding=(0, 1)),
                          basic_conv(bd, p["bd_3b"], padding=(1, 0))], axis=-1)
    bp = basic_conv(avg_pool3x3_s1_p1(x), p["bp"])
    return jnp.concatenate([b1, b3, bd, bp], axis=-1)


def make_inception_v3_params():
    return dict(
        c1a=make_basic_conv(3, 32, 3, 3),
        c2a=make_basic_conv(32, 32, 3, 3),
        c2b=make_basic_conv(32, 64, 3, 3),
        c3b=make_basic_conv(64, 80, 1, 1),
        c4a=make_basic_conv(80, 192, 3, 3),
        m5b=make_inception_a(192, 32),
        m5c=make_inception_a(256, 64),
        m5d=make_inception_a(288, 64),
        m6a=make_inception_b(288),
        m6b=make_inception_c(768, 128),
        m6c=make_inception_c(768, 160),
        m6d=make_inception_c(768, 160),
        m6e=make_inception_c(768, 192),
        m7a=make_inception_d(768),
        m7b=make_inception_e(1280),
        m7c=make_inception_e(2048))


def inception_v3_forward(x_nchw, p):
    """Equivalent of InceptionV3.forward: returns (N, 2048) features."""
    x = jnp.transpose(x_nchw, (0, 2, 3, 1)).astype(jnp.bfloat16)  # NCHW->NHWC
    # block1
    x = basic_conv(x, p["c1a"], stride=(2, 2))
    x = basic_conv(x, p["c2a"])
    x = basic_conv(x, p["c2b"], padding=(1, 1))
    x = max_pool3x3_s2(x)
    # block2
    x = basic_conv(x, p["c3b"])
    x = basic_conv(x, p["c4a"])
    x = max_pool3x3_s2(x)
    # block3
    x = inception_a(x, p["m5b"])
    x = inception_a(x, p["m5c"])
    x = inception_a(x, p["m5d"])
    x = inception_b(x, p["m6a"])
    x = inception_c(x, p["m6b"])
    x = inception_c(x, p["m6c"])
    x = inception_c(x, p["m6d"])
    x = inception_c(x, p["m6e"])
    # block4
    x = inception_d(x, p["m7a"])
    x = inception_e(x, p["m7b"])
    x = inception_e(x, p["m7c"])
    x = global_avg_pool(x)               # AdaptiveAvgPool2d((1,1)) + view
    return x


if __name__ == "__main__":
    # Smallest spatial size compatible with the InceptionV3 stride chain is 75.
    x = jax.random.normal(jax.random.PRNGKey(0), (2, 3, 75, 75), dtype=jnp.float32)
    params = make_inception_v3_params()
    out = inception_v3_forward(x, params)
    out = jax.block_until_ready(out)
    assert out.shape == (2, 2048), out.shape
    assert out.dtype == jnp.float32
    print("KERNEL_OK")
</pallas_src>

<mosaic_0001>
module attributes {stable_mosaic.version = 11 : i64} {
  func.func @_mm_heads_kernel(%arg0: i32, %arg1: memref<464x27xbf16, #tpu.memory_space<vmem>>, %arg2: memref<27x32xbf16, #tpu.memory_space<vmem>>, %arg3: memref<1x32xf32, #tpu.memory_space<vmem>>, %arg4: memref<464x32xbf16, #tpu.memory_space<vmem>>) attributes {dimension_semantics = [#tpu.dimension_semantics<parallel>], iteration_bounds = array<i64: 6>, scalar_prefetch = 0 : i64, scratch_operands = 0 : i64, tpu.core_type = #tpu.core_type<tc>, window_params = [{transform_indices = @transform_0, window_bounds = array<i64: 464, 27>}, {pipeline_mode = #tpu.pipeline_mode<synchronous>, transform_indices = @transform_1, window_bounds = array<i64: 27, 32>}, {pipeline_mode = #tpu.pipeline_mode<synchronous>, transform_indices = @transform_2, window_bounds = array<i64: 1, 32>}, {transform_indices = @transform_3, window_bounds = array<i64: 464, 32>}]} {
    %c0 = arith.constant 0 : index
    %c0_0 = arith.constant 0 : index
    %0 = vector.load %arg1[%c0, %c0_0] : memref<464x27xbf16, #tpu.memory_space<vmem>>, vector<464x27xbf16>
    %c0_1 = arith.constant 0 : index
    %c0_2 = arith.constant 0 : index
    %1 = vector.load %arg2[%c0_1, %c0_2] : memref<27x32xbf16, #tpu.memory_space<vmem>>, vector<27x32xbf16>
    %cst = arith.constant dense<0.000000e+00> : vector<464x32xf32>
    %2 = tpu.matmul %0, %1, %cst {dimension_numbers = #tpu.dot_dimension_numbers<[1], [0], [0], [1], [0, 0, 1, 1], [], []>} : vector<464x27xbf16>, vector<27x32xbf16>, vector<464x32xf32> -> vector<464x32xf32>
    %c0_3 = arith.constant 0 : index
    %c0_4 = arith.constant 0 : index
    %3 = vector.load %arg3[%c0_3, %c0_4] : memref<1x32xf32, #tpu.memory_space<vmem>>, vector<1x32xf32>
    %4 = vector.broadcast %3 : vector<1x32xf32> to vector<464x32xf32>
    %5 = arith.addf %2, %4 : vector<464x32xf32>
    %cst_5 = arith.constant 0.000000e+00 : f32
    %6 = vector.broadcast %cst_5 : f32 to vector<464x32xf32>
    %7 = arith.maximumf %5, %6 : vector<464x32xf32>
    %8 = arith.truncf %7 : vector<464x32xf32> to vector<464x32xbf16>
    %c0_6 = arith.constant 0 : index
    %c0_7 = arith.constant 0 : index
    %9 = vector.load %arg4[%c0_6, %c0_7] : memref<464x32xbf16, #tpu.memory_space<vmem>>, vector<464x32xbf16>
    tpu.vector_store %arg4[%c0_6, %c0_7], %8 {strides = array<i32>} : memref<464x32xbf16, #tpu.memory_space<vmem>>, vector<464x32xbf16>,
    return
  }
  func.func @transform_0(%arg0: i32) -> (i32, i32) {
    %c0_i32 = arith.constant 0 : i32
    %c0_i32_0 = arith.constant 0 : i32
    return %arg0, %c0_i32 : i32, i32
  }
  func.func @transform_1(%arg0: i32) -> (i32, i32) {
    %c0_i32 = arith.constant 0 : i32
    %c0_i32_0 = arith.constant 0 : i32
    %c0_i32_1 = arith.constant 0 : i32
    return %c0_i32, %c0_i32_0 : i32, i32
  }
  func.func @transform_2(%arg0: i32) -> (i32, i32) {
    %c0_i32 = arith.constant 0 : i32
    %c0_i32_0 = arith.constant 0 : i32
    %c0_i32_1 = arith.constant 0 : i32
    return %c0_i32, %c0_i32_0 : i32, i32
  }
  func.func @transform_3(%arg0: i32) -> (i32, i32) {
    %c0_i32 = arith.constant 0 : i32
    %c0_i32_0 = arith.constant 0 : i32
    return %arg0, %c0_i32 : i32, i32
  }
}

</mosaic_0001>

<bundles_post_ra>
// kernel: tpu_custom_call.1
= control target key start
LH: loop header
LB: loop body
LE: loop exit
PB: predicated region body
PF: predicated region fallthrough
CT: control target
= control target key end

     0   :  { %s2160_s12 = smov 0   ;;  %s2162_s13 = smov 0   ;;  %s2689_s0 = inlined_call_operand.vmem [shape: bf16[2738,27], index: 0, kind: input, shape index: {}]   ;;  %s2690_s1 = inlined_call_operand.vmem [shape: bf16[27,32], index: 1, kind: input, shape index: {}]   ;;  %s2691_s2 = inlined_call_operand.vmem [shape: f32[1,32], index: 2, kind: input, shape index: {}]   ;;  %s2692_s3 = inlined_call_operand.vmem [shape: bf16[2738,32], index: 3, kind: output, shape index: {}]  }
   0x1   :  { %s2164_s14 = smov 0  }
   0x2 LB: > { %s2173_s15 = sadd.s32 4294967295, %s2103_s14   ;;  %s2175_s16 = sadd.s32 1, %s2103_s14   ;;  %s2103_s14 = sphi %s2164_s14, %s2699_s14   ;;  %s2099_s13 = sphi %s2162_s13, %s2698_s13   ;;  %s2095_s12 = sphi %s2160_s12, %s2697_s12  }
   0x3   : > { %s85_s17 = ssub.s32 %s2103_s14, %s2175_s16  ;;  %s88_s18 = sadd.s32 1, %s2099_s13 }
   0x4   : > { %p86_p0 = scmp.eq.s32.totalorder %s85_s17, 0  ;;  %p98_p1 = scmp.ne.s32.totalorder %s2099_s13, %s2095_s12 }
   0x5   : > { %p99_p2 = scmp.eq.s32.totalorder %s2173_s15, 5  ;;  %p1574_p3 = scmp.ge.s32.totalorder %s2103_s14, 1 }
   0x6   : > { %s2183_s19 = scalar_select %p86_p0, %s2099_s13, %s88_s18  }
   0x7   : > { %p2185_p4 = por %p99_p2, %p98_p1  ;;  %p146_p5 = scmp.lt.s32.totalorder %s2103_s14, 7 }
   0x9   : > { %p147_p6 = pnand %p1574_p3, %p146_p5 }
   0xa   : > { %v2014_v0 = vld [vmem:[%s2690_s1] sm:$0xff] (!%p147_p6)   ;;  %v2137_v1 = vmov (!%p147_p6), 0.0   ;;  %v2015_v2 = vld [vmem:[%s2690_s1 + $0x8] sm:$0x3f] (!%p147_p6)   ;;  %vm506_vm0 = vcmask (!%p147_p6), 1044480   ;;  %vm507_vm1 = vcmask (!%p147_p6), 1045504  }
   0xb   : > { %150 = sbr.rel (%p147_p6) target bundleno = 456 (0x1c8), region = 32  ;;  %1797 = vmatprep.subr.bf16.mxu0 (!%p147_p6), %v2137_v1  ;;  %1917 = vmatprep.subr.bf16.mxu1 (!%p147_p6), %v2137_v1  ;;  %v2138_v3 = vmov (!%p147_p6), 65535   ;;  %vm2139_vm2 = vmmov (!%p147_p6), 0   ;;  %vm418_vm3 = vcmask (!%p147_p6), 220160   ;;  %s170_s4 = sand.u32 (!%p147_p6), 1, %s2095_s12   ;;  %vm1068_vm4 = vcmask (!%p147_p6), 257024  }
   0xc   : > { %1798 = vmatpush3.bf16.msra.mxu0 (!%p147_p6), %v2014_v0  ;;  %1919 = vmatpush3.bf16.msra.mxu1 (!%p147_p6), %v2014_v0  ;;  %s2198_s25 = smul.u32 (!%p147_p6), 58, %s2173_s15  ;;  %v508_v4 = vsel (!%p147_p6), %vm506_vm0, 4294967295, %v2138_v3  ;;  %v2329_v36 = vld [vmem:[%s2691_s2] ss:$0 sm:$0xff] (!%p147_p6) }
   0xd   : > { %1799 = vmatprep.subr.bf16.mxu0 (!%p147_p6), %v2137_v1  ;;  %1801 = vmatprep.mubr.msk.bf16.mxu0 (!%p147_p6), %vm2139_vm2, %v2137_v1  ;;  %v509_v5 = vsel (!%p147_p6), %vm507_vm1, %v508_v4, 0  ;;  %s1921_s7 = smul.u32 (!%p147_p6), 232, %s170_s4 }
   0xe   : > { %p178_p7 = scmp.lt.s32.totalorder (!%p147_p6), %s2198_s25, 342  ;;  %1918 = vmatprep.subr.bf16.mxu1 (!%p147_p6), %v2137_v1  ;;  %1861 = vmatprep.mubr.msk.bf16.mxu1 (!%p147_p6), %vm2139_vm2, %v2137_v1  ;;  %v511_v6 = vand.u32 (!%p147_p6), %v2015_v2, %v509_v5 }
   0xf   : > { %s2335_s8 = scalar_lea.vmem (!%p147_p6), [#allocation2], %s1921_s7  }
  0x10   : > { %1800 = vmatpush3.bf16.msra.mxu0 (!%p147_p6), %v511_v6  ;;  %1920 = vmatpush3.bf16.msra.mxu1 (!%p147_p6), %v511_v6 }
  0x12   : > { %s179_s26 = scalar_select %p178_p7, %s2198_s25, 342 }
  0x13   : > { %s1135_s9 = ssub.s32 (%p2185_p4), 343, %s2198_s25  ;;  %s1765_s10 = smul.u32 (%p2185_p4), 232, %s2173_s15 }
  0x14   : > { %s1575_s27 = sshll.u32 %s179_s26, 2  ;;  %p1136_p8 = scmp.lt.s32.totalorder (%p2185_p4), %s1135_s9, 58 }
  0x15   : > { %s2211_s30 = scalar_lea.vmem %s2689_s0, %s1575_s27  ;;  %s2514_s14 = scalar_lea.vmem (%p2185_p4), %s2692_s3, %s1765_s10  }
  0x16   : > { %v2016_v7 = vld [vmem:[%s2211_s30] sm:$0xff]   ;;  %v2017_v8 = vld [vmem:[%s2211_s30 + $0x78] sm:$0xff]   ;;  %v2018_v9 = vld [vmem:[%s2211_s30 + $0x8] sm:$0xff]  }
  0x17   : > { %1802 = vmatmul.mubr.msk.bf16.vlgmr.msra.gmra.mrb[0].mxu0 %vm418_vm3, %v2016_v7  ;;  %1862 = vmatmul.mubr.msk.bf16.vlgmr.msra.gmra.mrb[0].mxu1 %vm418_vm3, %v2017_v8  ;;  %v2019_v10 = vld [vmem:[%s2211_s30 + $0x80] sm:$0xff]   ;;  %v2020_v11 = vld [vmem:[%s2211_s30 + $0x10] sm:$0xff]   ;;  %v2021_v12 = vld [vmem:[%s2211_s30 + $0x88] sm:$0xff]  }
  0x18   : > { %1805 = vmatprep.mubr.msk.bf16.mxu0 %vm2139_vm2, %v2137_v1  ;;  %1865 = vmatprep.mubr.msk.bf16.mxu1 %vm2139_vm2, %v2137_v1  ;;  %v2022_v13 = vld [vmem:[%s2211_s30 + $0x18] sm:$0xff]   ;;  %v2023_v14 = vld [vmem:[%s2211_s30 + $0x90] sm:$0xff]   ;;  %v2024_v15 = vld [vmem:[%s2211_s30 + $0x20] sm:$0xff]  }
  0x19   : > { %v2025_v16 = vld [vmem:[%s2211_s30 + $0x98] sm:$0xff]   ;;  %v2026_v17 = vld [vmem:[%s2211_s30 + $0x28] sm:$0xff]   ;;  %v2027_v18 = vld [vmem:[%s2211_s30 + $0xa0] sm:$0xff]  }
  0x1a   : > { %v2028_v19 = vld [vmem:[%s2211_s30 + $0x30] sm:$0xff]   ;;  %v2029_v20 = vld [vmem:[%s2211_s30 + $0xa8] sm:$0xff]   ;;  %v2030_v21 = vld [vmem:[%s2211_s30 + $0x38] sm:$0xff]  }
  0x1b   : > { %v2031_v22 = vld [vmem:[%s2211_s30 + $0xb0] sm:$0xff]   ;;  %v2032_v23 = vld [vmem:[%s2211_s30 + $0x40] sm:$0xff]   ;;  %v2033_v24 = vld [vmem:[%s2211_s30 + $0xb8] sm:$0xff]  }
  0x1c   : > { %v2034_v25 = vld [vmem:[%s2211_s30 + $0x48] sm:$0xff]   ;;  %v2035_v26 = vld [vmem:[%s2211_s30 + $0xc0] sm:$0xff]   ;;  %v2036_v27 = vld [vmem:[%s2211_s30 + $0x50] sm:$0xff]  }
  0x1d   : > { %v2037_v28 = vld [vmem:[%s2211_s30 + $0xc8] sm:$0xff]   ;;  %v2038_v29 = vld [vmem:[%s2211_s30 + $0x58] sm:$0xff]   ;;  %v2039_v30 = vld [vmem:[%s2211_s30 + $0xd0] sm:$0xff]  }
  0x1e   : > { %v2040_v31 = vld [vmem:[%s2211_s30 + $0x60] sm:$0xff]   ;;  %v2041_v32 = vld [vmem:[%s2211_s30 + $0xd8] sm:$0xff]   ;;  %v2042_v33 = vld [vmem:[%s2211_s30 + $0x68] sm:$0xff]  }
  0x1f   : > { %1806 = vmatmul.mubr.msk.bf16.gmra.mrb[4].mxu0 %vm418_vm3, %v2018_v9  ;;  %1866 = vmatmul.mubr.msk.bf16.gmra.mrb[4].mxu1 %vm418_vm3, %v2019_v10  ;;  %v2043_v34 = vld [vmem:[%s2211_s30 + $0xe0] sm:$0xff]   ;;  %v2044_v35 = vld [vmem:[%s2211_s30 + $0x70] sm:$0xff]  }
  0x20   : > { %1809 = vmatprep.mubr.msk.bf16.mxu0 %vm2139_vm2, %v2137_v1  ;;  %1869 = vmatprep.mubr.msk.bf16.mxu1 %vm2139_vm2, %v2137_v1 }
  0x27   : > { %1810 = vmatmul.mubr.msk.bf16.gmra.mrb[8].mxu0 %vm418_vm3, %v2020_v11  ;;  %1870 = vmatmul.mubr.msk.bf16.gmra.mrb[8].mxu1 %vm418_vm3, %v2021_v12 }
  0x28   : > { %1813 = vmatprep.mubr.msk.bf16.mxu0 %vm2139_vm2, %v2137_v1  ;;  %1873 = vmatprep.mubr.msk.bf16.mxu1 %vm2139_vm2, %v2137_v1 }
  0x2f   : > { %1814 = vmatmul.mubr.msk.bf16.gmra.mrb[12].mxu0 %vm418_vm3, %v2022_v13  ;;  %1874 = vmatmul.mubr.msk.bf16.gmra.mrb[12].mxu1 %vm418_vm3, %v2023_v14 }
  0x30   : > { %1817 = vmatprep.mubr.msk.bf16.mxu0 %vm2139_vm2, %v2137_v1  ;;  %1877 = vmatprep.mubr.msk.bf16.mxu1 %vm2139_vm2, %v2137_v1 }
  0x37   : > { %1818 = vmatmul.mubr.msk.bf16.gmra.mrb[16].mxu0 %vm418_vm3, %v2024_v15  ;;  %1878 = vmatmul.mubr.msk.bf16.gmra.mrb[16].mxu1 %vm418_vm3, %v2025_v16 }
  0x38   : > { %1821 = vmatprep.mubr.msk.bf16.mxu0 %vm2139_vm2, %v2137_v1  ;;  %1881 = vmatprep.mubr.msk.bf16.mxu1 %vm2139_vm2, %v2137_v1 }
  0x3f   : > { %1822 = vmatmul.mubr.msk.bf16.gmra.mrb[20].mxu0 %vm418_vm3, %v2026_v17  ;;  %1882 = vmatmul.mubr.msk.bf16.gmra.mrb[20].mxu1 %vm418_vm3, %v2027_v18 }
  0x40   : > { %1825 = vmatprep.mubr.msk.bf16.mxu0 %vm2139_vm2, %v2137_v1  ;;  %1885 = vmatprep.mubr.msk.bf16.mxu1 %vm2139_vm2, %v2137_v1 }
  0x47   : > { %1826 = vmatmul.mubr.msk.bf16.gmra.mrb[24].mxu0 %vm418_vm3, %v2028_v19  ;;  %1886 = vmatmul.mubr.msk.bf16.gmra.mrb[24].mxu1 %vm418_vm3, %v2029_v20 }
  0x48   : > { %1829 = vmatprep.mubr.msk.bf16.mxu0 %vm2139_vm2, %v2137_v1  ;;  %1889 = vmatprep.mubr.msk.bf16.mxu1 %vm2139_vm2, %v2137_v1 }
  0x4f   : > { %1830 = vmatmul.mubr.msk.bf16.gmra.mrb[28].mxu0 %vm418_vm3, %v2030_v21  ;;  %1890 = vmatmul.mubr.msk.bf16.gmra.mrb[28].mxu1 %vm418_vm3, %v2031_v22 }
  0x50   : > { %1833 = vmatprep.mubr.msk.bf16.mxu0 %vm2139_vm2, %v2137_v1  ;;  %1893 = vmatprep.mubr.msk.bf16.mxu1 %vm2139_vm2, %v2137_v1 }
  0x57   : > { %1834 = vmatmul.mubr.msk.bf16.gmra.mrb[32].mxu0 %vm418_vm3, %v2032_v23  ;;  %1894 = vmatmul.mubr.msk.bf16.gmra.mrb[32].mxu1 %vm418_vm3, %v2033_v24 }
  0x58   : > { %1837 = vmatprep.mubr.msk.bf16.mxu0 %vm2139_vm2, %v2137_v1  ;;  %1897 = vmatprep.mubr.msk.bf16.mxu1 %vm2139_vm2, %v2137_v1 }
  0x5f   : > { %1838 = vmatmul.mubr.msk.bf16.gmra.mrb[36].mxu0 %vm418_vm3, %v2034_v25  ;;  %1898 = vmatmul.mubr.msk.bf16.gmra.mrb[36].mxu1 %vm418_vm3, %v2035_v26 }
  0x60   : > { %1841 = vmatprep.mubr.msk.bf16.mxu0 %vm2139_vm2, %v2137_v1  ;;  %1901 = vmatprep.mubr.msk.bf16.mxu1 %vm2139_vm2, %v2137_v1 }
  0x67   : > { %1842 = vmatmul.mubr.msk.bf16.gmra.mrb[40].mxu0 %vm418_vm3, %v2036_v27  ;;  %1902 = vmatmul.mubr.msk.bf16.gmra.mrb[40].mxu1 %vm418_vm3, %v2037_v28 }
  0x68   : > { %1845 = vmatprep.mubr.msk.bf16.mxu0 %vm2139_vm2, %v2137_v1  ;;  %1905 = vmatprep.mubr.msk.bf16.mxu1 %vm2139_vm2, %v2137_v1 }
  0x6f   : > { %1846 = vmatmul.mubr.msk.bf16.gmra.mrb[44].mxu0 %vm418_vm3, %v2038_v29  ;;  %1906 = vmatmul.mubr.msk.bf16.gmra.mrb[44].mxu1 %vm418_vm3, %v2039_v30 }
  0x70   : > { %1849 = vmatprep.mubr.msk.bf16.mxu0 %vm2139_vm2, %v2137_v1  ;;  %1909 = vmatprep.mubr.msk.bf16.mxu1 %vm2139_vm2, %v2137_v1 }
  0x77   : > { %1850 = vmatmul.mubr.msk.bf16.gmra.mrb[48].mxu0 %vm418_vm3, %v2040_v31  ;;  %1910 = vmatmul.mubr.msk.bf16.gmra.mrb[48].mxu1 %vm418_vm3, %v2041_v32 }
  0x78   : > { %1853 = vmatprep.mubr.msk.bf16.mxu0 %vm2139_vm2, %v2137_v1  ;;  %1913 = vmatprep.mubr.msk.bf16.mxu1 %vm2139_vm2, %v2137_v1 }
  0x7f   : > { %1854 = vmatmul.mubr.msk.bf16.gmra.mrb[52].mxu0 %vm418_vm3, %v2042_v33  ;;  %1914 = vmatmul.mubr.msk.bf16.gmra.mrb[52].mxu1 %vm418_vm3, %v2043_v34 }
  0x80   : > { %1857 = vmatprep.mubr.msk.bf16.mxu0 %vm2139_vm2, %v2137_v1 }
  0x87   : > { %1858 = vmatmul.mubr.msk.bf16.gmra.mrb[56].mxu0 %vm418_vm3, %v2044_v35 }
  0xea   : > { %v547_v37 = vpop.f32.mrb[0].mxu0  ;;  %v667_v40 = vpop.f32.mrb[0].mxu1 }
  0xeb   : > { %v548_v38 = vadd.f32 %v2329_v36, %v547_v37  ;;  %v1803_v39 = vpop.f32.mrb[1].mxu0  ;;  %v668_v42 = vadd.f32 %v2329_v36, %v667_v40  ;;  %v1863_v43 = vpop.f32.mrb[1].mxu1 }
  0xec   : > { %v550_v41 = vpop.f32.mrb[2].mxu0  ;;  %v670_v47 = vpop.f32.mrb[2].mxu1 }
  0xed   : > { %v778_v44 = vmax.f32 %v548_v38, 0.0  ;;  %v551_v45 = vadd.f32 %v2329_v36, %v550_v41  ;;  %v1804_v46 = vpop.f32.mrb[3].mxu0  ;;  %v808_v48 = vmax.f32 %v668_v42, 0.0  ;;  %v671_v49 = vadd.f32 %v2329_v36, %v670_v47  ;;  %v1864_v50 = vpop.f32.mrb[3].mxu1 }
  0xef   : > { %v1707_v51 = vpack.c.bf16 %v778_v44, %v778_v44  ;;  %v779_v52 = vmax.f32 %v551_v45, 0.0  ;;  %v1737_v53 = vpack.c.bf16 %v808_v48, %v808_v48  ;;  %v809_v54 = vmax.f32 %v671_v49, 0.0 }
  0xf1   : > { %1069 = vst.msk [vmem:[%s2335_s8] sm:$0xf] %vm1068_vm4, %v1707_v51  ;;  %v1708_v55 = vpack.c.bf16 %v779_v52, %v779_v52  ;;  %1099 = vst.msk [vmem:[%s2335_s8 + $0x78] sm:$0xf] %vm1068_vm4, %v1737_v53  ;;  %v1738_v56 = vpack.c.bf16 %v809_v54, %v809_v54 }
  0xf2   : > { %v555_v57 = vpop.f32.mrb[4].mxu0  ;;  %v675_v60 = vpop.f32.mrb[4].mxu1 }
  0xf3   : > { %1070 = vst.msk [vmem:[%s2335_s8 + $0x4] sm:$0xf] %vm1068_vm4, %v1708_v55  ;;  %v556_v58 = vadd.f32 %v2329_v36, %v555_v57  ;;  %v1807_v59 = vpop.f32.mrb[5].mxu0  ;;  %1100 = vst.msk [vmem:[%s2335_s8 + $0x7c] sm:$0xf] %vm1068_vm4, %v1738_v56  ;;  %v676_v62 = vadd.f32 %v2329_v36, %v675_v60  ;;  %v1867_v63 = vpop.f32.mrb[5].mxu1 }
  0xf4   : > { %v558_v61 = vpop.f32.mrb[6].mxu0  ;;  %v678_v3 = vpop.f32.mrb[6].mxu1 }
  0xf5   : > { %v780_v0 = vmax.f32 %v556_v58, 0.0  ;;  %v559_v1 = vadd.f32 %v2329_v36, %v558_v61  ;;  %v1808_v2 = vpop.f32.mrb[7].mxu0  ;;  %v810_v4 = vmax.f32 %v676_v62, 0.0  ;;  %v679_v5 = vadd.f32 %v2329_v36, %v678_v3  ;;  %v1868_v6 = vpop.f32.mrb[7].mxu1 }
  0xf7   : > { %v1709_v7 = vpack.c.bf16 %v780_v0, %v780_v0  ;;  %v781_v8 = vmax.f32 %v559_v1, 0.0  ;;  %v1739_v9 = vpack.c.bf16 %v810_v4, %v810_v4  ;;  %v811_v10 = vmax.f32 %v679_v5, 0.0 }
  0xf9   : > { %1071 = vst.msk [vmem:[%s2335_s8 + $0x8] sm:$0xf] %vm1068_vm4, %v1709_v7  ;;  %v1710_v11 = vpack.c.bf16 %v781_v8, %v781_v8  ;;  %1101 = vst.msk [vmem:[%s2335_s8 + $0x80] sm:$0xf] %vm1068_vm4, %v1739_v9  ;;  %v1740_v12 = vpack.c.bf16 %v811_v10, %v811_v10 }
  0xfa   : > { %v563_v13 = vpop.f32.mrb[8].mxu0  ;;  %v683_v16 = vpop.f32.mrb[8].mxu1 }
  0xfb   : > { %1072 = vst.msk [vmem:[%s2335_s8 + $0xc] sm:$0xf] %vm1068_vm4, %v1710_v11  ;;  %v564_v14 = vadd.f32 %v2329_v36, %v563_v13  ;;  %v1811_v15 = vpop.f32.mrb[9].mxu0  ;;  %1102 = vst.msk [vmem:[%s2335_s8 + $0x84] sm:$0xf] %vm1068_vm4, %v1740_v12  ;;  %v684_v18 = vadd.f32 %v2329_v36, %v683_v16  ;;  %v1871_v19 = vpop.f32.mrb[9].mxu1 }
  0xfc   : > { %v566_v17 = vpop.f32.mrb[10].mxu0  ;;  %v686_v23 = vpop.f32.mrb[10].mxu1 }
  0xfd   : > { %v782_v20 = vmax.f32 %v564_v14, 0.0  ;;  %v567_v21 = vadd.f32 %v2329_v36, %v566_v17  ;;  %v1812_v22 = vpop.f32.mrb[11].mxu0  ;;  %v812_v24 = vmax.f32 %v684_v18, 0.0  ;;  %v687_v25 = vadd.f32 %v2329_v36, %v686_v23  ;;  %v1872_v26 = vpop.f32.mrb[11].mxu1 }
  0xff   : > { %v1711_v27 = vpack.c.bf16 %v782_v20, %v782_v20  ;;  %v783_v28 = vmax.f32 %v567_v21, 0.0  ;;  %v1741_v29 = vpack.c.bf16 %v812_v24, %v812_v24  ;;  %v813_v30 = vmax.f32 %v687_v25, 0.0 }
 0x101   : > { %1073 = vst.msk [vmem:[%s2335_s8 + $0x10] sm:$0xf] %vm1068_vm4, %v1711_v27  ;;  %v1712_v31 = vpack.c.bf16 %v783_v28, %v783_v28  ;;  %1103 = vst.msk [vmem:[%s2335_s8 + $0x88] sm:$0xf] %vm1068_vm4, %v1741_v29  ;;  %v1742_v32 = vpack.c.bf16 %v813_v30, %v813_v30 }
 0x102   : > { %v571_v33 = vpop.f32.mrb[12].mxu0  ;;  %v691_v37 = vpop.f32.mrb[12].mxu1 }
 0x103   : > { %1074 = vst.msk [vmem:[%s2335_s8 + $0x14] sm:$0xf] %vm1068_vm4, %v1712_v31  ;;  %v572_v34 = vadd.f32 %v2329_v36, %v571_v33  ;;  %v1815_v35 = vpop.f32.mrb[13].mxu0  ;;  %1104 = vst.msk [vmem:[%s2335_s8 + $0x8c] sm:$0xf] %vm1068_vm4, %v1742_v32  ;;  %v692_v39 = vadd.f32 %v2329_v36, %v691_v37  ;;  %v1875_v40 = vpop.f32.mrb[13].mxu1 }
 0x104   : > { %v574_v38 = vpop.f32.mrb[14].mxu0  ;;  %v694_v44 = vpop.f32.mrb[14].mxu1 }
 0x105   : > { %v784_v41 = vmax.f32 %v572_v34, 0.0  ;;  %v575_v42 = vadd.f32 %v2329_v36, %v574_v38  ;;  %v1816_v43 = vpop.f32.mrb[15].mxu0  ;;  %v814_v45 = vmax.f32 %v692_v39, 0.0  ;;  %v695_v46 = vadd.f32 %v2329_v36, %v694_v44  ;;  %v1876_v47 = vpop.f32.mrb[15].mxu1 }
 0x107   : > { %v1713_v48 = vpack.c.bf16 %v784_v41, %v784_v41  ;;  %v785_v49 = vmax.f32 %v575_v42, 0.0  ;;  %v1743_v50 = vpack.c.bf16 %v814_v45, %v814_v45  ;;  %v815_v51 = vmax.f32 %v695_v46, 0.0 }
 0x109   : > { %1075 = vst.msk [vmem:[%s2335_s8 + $0x18] sm:$0xf] %vm1068_vm4, %v1713_v48  ;;  %v1714_v52 = vpack.c.bf16 %v785_v49, %v785_v49  ;;  %1105 = vst.msk [vmem:[%s2335_s8 + $0x90] sm:$0xf] %vm1068_vm4, %v1743_v50  ;;  %v1744_v53 = vpack.c.bf16 %v815_v51, %v815_v51 }
 0x10a   : > { %v579_v54 = vpop.f32.mrb[16].mxu0  ;;  %v699_v57 = vpop.f32.mrb[16].mxu1 }
 0x10b   : > { %1076 = vst.msk [vmem:[%s2335_s8 + $0x1c] sm:$0xf] %vm1068_vm4, %v1714_v52  ;;  %v580_v55 = vadd.f32 %v2329_v36, %v579_v54  ;;  %v1819_v56 = vpop.f32.mrb[17].mxu0  ;;  %1106 = vst.msk [vmem:[%s2335_s8 + $0x94] sm:$0xf] %vm1068_vm4, %v1744_v53  ;;  %v700_v59 = vadd.f32 %v2329_v36, %v699_v57  ;;  %v1879_v60 = vpop.f32.mrb[17].mxu1 }
 0x10c   : > { %v582_v58 = vpop.f32.mrb[18].mxu0  ;;  %v702_v0 = vpop.f32.mrb[18].mxu1 }
 0x10d   : > { %v786_v61 = vmax.f32 %v580_v55, 0.0  ;;  %v583_v62 = vadd.f32 %v2329_v36, %v582_v58  ;;  %v1820_v63 = vpop.f32.mrb[19].mxu0  ;;  %v816_v1 = vmax.f32 %v700_v59, 0.0  ;;  %v703_v2 = vadd.f32 %v2329_v36, %v702_v0  ;;  %v1880_v3 = vpop.f32.mrb[19].mxu1 }
 0x10f   : > { %v1715_v4 = vpack.c.bf16 %v786_v61, %v786_v61  ;;  %v787_v5 = vmax.f32 %v583_v62, 0.0  ;;  %v1745_v6 = vpack.c.bf16 %v816_v1, %v816_v1  ;;  %v817_v7 = vmax.f32 %v703_v2, 0.0 }
 0x111   : > { %1077 = vst.msk [vmem:[%s2335_s8 + $0x20] sm:$0xf] %vm1068_vm4, %v1715_v4  ;;  %v1716_v8 = vpack.c.bf16 %v787_v5, %v787_v5  ;;  %1107 = vst.msk [vmem:[%s2335_s8 + $0x98] sm:$0xf] %vm1068_vm4, %v1745_v6  ;;  %v1746_v9 = vpack.c.bf16 %v817_v7, %v817_v7 }
 0x112   : > { %v587_v10 = vpop.f32.mrb[20].mxu0  ;;  %v707_v13 = vpop.f32.mrb[20].mxu1 }
 0x113   : > { %1078 = vst.msk [vmem:[%s2335_s8 + $0x24] sm:$0xf] %vm1068_vm4, %v1716_v8  ;;  %v588_v11 = vadd.f32 %v2329_v36, %v587_v10  ;;  %v1823_v12 = vpop.f32.mrb[21].mxu0  ;;  %1108 = vst.msk [vmem:[%s2335_s8 + $0x9c] sm:$0xf] %vm1068_vm4, %v1746_v9  ;;  %v708_v15 = vadd.f32 %v2329_v36, %v707_v13  ;;  %v1883_v16 = vpop.f32.mrb[21].mxu1 }
 0x114   : > { %v590_v14 = vpop.f32.mrb[22].mxu0  ;;  %v710_v20 = vpop.f32.mrb[22].mxu1 }
 0x115   : > { %v788_v17 = vmax.f32 %v588_v11, 0.0  ;;  %v591_v18 = vadd.f32 %v2329_v36, %v590_v14  ;;  %v1824_v19 = vpop.f32.mrb[23].mxu0  ;;  %v818_v21 = vmax.f32 %v708_v15, 0.0  ;;  %v711_v22 = vadd.f32 %v2329_v36, %v710_v20  ;;  %v1884_v23 = vpop.f32.mrb[23].mxu1 }
 0x117   : > { %v1717_v24 = vpack.c.bf16 %v788_v17, %v788_v17  ;;  %v789_v25 = vmax.f32 %v591_v18, 0.0  ;;  %v1747_v26 = vpack.c.bf16 %v818_v21, %v818_v21  ;;  %v819_v27 = vmax.f32 %v711_v22, 0.0 }
 0x119   : > { %1079 = vst.msk [vmem:[%s2335_s8 + $0x28] sm:$0xf] %vm1068_vm4, %v1717_v24  ;;  %v1718_v28 = vpack.c.bf16 %v789_v25, %v789_v25  ;;  %1109 = vst.msk [vmem:[%s2335_s8 + $0xa0] sm:$0xf] %vm1068_vm4, %v1747_v26  ;;  %v1748_v29 = vpack.c.bf16 %v819_v27, %v819_v27 }
 0x11a   : > { %v595_v30 = vpop.f32.mrb[24].mxu0  ;;  %v715_v33 = vpop.f32.mrb[24].mxu1 }
 0x11b   : > { %1080 = vst.msk [vmem:[%s2335_s8 + $0x2c] sm:$0xf] %vm1068_vm4, %v1718_v28  ;;  %v596_v31 = vadd.f32 %v2329_v36, %v595_v30  ;;  %v1827_v32 = vpop.f32.mrb[25].mxu0  ;;  %1110 = vst.msk [vmem:[%s2335_s8 + $0xa4] sm:$0xf] %vm1068_vm4, %v1748_v29  ;;  %v716_v35 = vadd.f32 %v2329_v36, %v715_v33  ;;  %v1887_v37 = vpop.f32.mrb[25].mxu1 }
 0x11c   : > { %v598_v34 = vpop.f32.mrb[26].mxu0  ;;  %v718_v41 = vpop.f32.mrb[26].mxu1 }
 0x11d   : > { %v790_v38 = vmax.f32 %v596_v31, 0.0  ;;  %v599_v39 = vadd.f32 %v2329_v36, %v598_v34  ;;  %v1828_v40 = vpop.f32.mrb[27].mxu0  ;;  %v820_v42 = vmax.f32 %v716_v35, 0.0  ;;  %v719_v43 = vadd.f32 %v2329_v36, %v718_v41  ;;  %v1888_v44 = vpop.f32.mrb[27].mxu1 }
 0x11f   : > { %v1719_v45 = vpack.c.bf16 %v790_v38, %v790_v38  ;;  %v791_v46 = vmax.f32 %v599_v39, 0.0  ;;  %v1749_v47 = vpack.c.bf16 %v820_v42, %v820_v42  ;;  %v821_v48 = vmax.f32 %v719_v43, 0.0 }
 0x121   : > { %1081 = vst.msk [vmem:[%s2335_s8 + $0x30] sm:$0xf] %vm1068_vm4, %v1719_v45  ;;  %v1720_v49 = vpack.c.bf16 %v791_v46, %v791_v46  ;;  %1111 = vst.msk [vmem:[%s2335_s8 + $0xa8] sm:$0xf] %vm1068_vm4, %v1749_v47  ;;  %v1750_v50 = vpack.c.bf16 %v821_v48, %v821_v48 }
 0x122   : > { %v603_v51 = vpop.f32.mrb[28].mxu0  ;;  %v723_v54 = vpop.f32.mrb[28].mxu1 }
 0x123   : > { %1082 = vst.msk [vmem:[%s2335_s8 + $0x34] sm:$0xf] %vm1068_vm4, %v1720_v49  ;;  %v604_v52 = vadd.f32 %v2329_v36, %v603_v51  ;;  %v1831_v53 = vpop.f32.mrb[29].mxu0  ;;  %1112 = vst.msk [vmem:[%s2335_s8 + $0xac] sm:$0xf] %vm1068_vm4, %v1750_v50  ;;  %v724_v56 = vadd.f32 %v2329_v36, %v723_v54  ;;  %v1891_v57 = vpop.f32.mrb[29].mxu1 }
 0x124   : > { %v606_v55 = vpop.f32.mrb[30].mxu0  ;;  %v726_v61 = vpop.f32.mrb[30].mxu1 }
 0x125   : > { %v792_v58 = vmax.f32 %v604_v52, 0.0  ;;  %v607_v59 = vadd.f32 %v2329_v36, %v606_v55  ;;  %v1832_v60 = vpop.f32.mrb[31].mxu0  ;;  %v822_v62 = vmax.f32 %v724_v56, 0.0  ;;  %v727_v63 = vadd.f32 %v2329_v36, %v726_v61  ;;  %v1892_v0 = vpop.f32.mrb[31].mxu1 }
 0x127   : > { %v1721_v1 = vpack.c.bf16 %v792_v58, %v792_v58  ;;  %v793_v2 = vmax.f32 %v607_v59, 0.0  ;;  %v1751_v3 = vpack.c.bf16 %v822_v62, %v822_v62  ;;  %v823_v4 = vmax.f32 %v727_v63, 0.0 }
 0x129   : > { %1083 = vst.msk [vmem:[%s2335_s8 + $0x38] sm:$0xf] %vm1068_vm4, %v1721_v1  ;;  %v1722_v5 = vpack.c.bf16 %v793_v2, %v793_v2  ;;  %1113 = vst.msk [vmem:[%s2335_s8 + $0xb0] sm:$0xf] %vm1068_vm4, %v1751_v3  ;;  %v1752_v6 = vpack.c.bf16 %v823_v4, %v823_v4 }
 0x12a   : > { %v611_v7 = vpop.f32.mrb[32].mxu0  ;;  %v731_v10 = vpop.f32.mrb[32].mxu1 }
 0x12b   : > { %1084 = vst.msk [vmem:[%s2335_s8 + $0x3c] sm:$0xf] %vm1068_vm4, %v1722_v5  ;;  %v612_v8 = vadd.f32 %v2329_v36, %v611_v7  ;;  %v1835_v9 = vpop.f32.mrb[33].mxu0  ;;  %1114 = vst.msk [vmem:[%s2335_s8 + $0xb4] sm:$0xf] %vm1068_vm4, %v1752_v6  ;;  %v732_v12 = vadd.f32 %v2329_v36, %v731_v10  ;;  %v1895_v13 = vpop.f32.mrb[33].mxu1 }
 0x12c   : > { %v614_v11 = vpop.f32.mrb[34].mxu0  ;;  %v734_v17 = vpop.f32.mrb[34].mxu1 }
 0x12d   : > { %v794_v14 = vmax.f32 %v612_v8, 0.0  ;;  %v615_v15 = vadd.f32 %v2329_v36, %v614_v11  ;;  %v1836_v16 = vpop.f32.mrb[35].mxu0  ;;  %v824_v18 = vmax.f32 %v732_v12, 0.0  ;;  %v735_v19 = vadd.f32 %v2329_v36, %v734_v17  ;;  %v1896_v20 = vpop.f32.mrb[35].mxu1 }
 0x12f   : > { %v1723_v21 = vpack.c.bf16 %v794_v14, %v794_v14  ;;  %v795_v22 = vmax.f32 %v615_v15, 0.0  ;;  %v1753_v23 = vpack.c.bf16 %v824_v18, %v824_v18  ;;  %v825_v24 = vmax.f32 %v735_v19, 0.0 }
 0x131   : > { %1085 = vst.msk [vmem:[%s2335_s8 + $0x40] sm:$0xf] %vm1068_vm4, %v1723_v21  ;;  %v1724_v25 = vpack.c.bf16 %v795_v22, %v795_v22  ;;  %1115 = vst.msk [vmem:[%s2335_s8 + $0xb8] sm:$0xf] %vm1068_vm4, %v1753_v23  ;;  %v1754_v26 = vpack.c.bf16 %v825_v24, %v825_v24 }
 0x132   : > { %v619_v27 = vpop.f32.mrb[36].mxu0  ;;  %v739_v30 = vpop.f32.mrb[36].mxu1 }
 0x133   : > { %1086 = vst.msk [vmem:[%s2335_s8 + $0x44] sm:$0xf] %vm1068_vm4, %v1724_v25  ;;  %v620_v28 = vadd.f32 %v2329_v36, %v619_v27  ;;  %v1839_v29 = vpop.f32.mrb[37].mxu0  ;;  %1116 = vst.msk [vmem:[%s2335_s8 + $0xbc] sm:$0xf] %vm1068_vm4, %v1754_v26  ;;  %v740_v32 = vadd.f32 %v2329_v36, %v739_v30  ;;  %v1899_v33 = vpop.f32.mrb[37].mxu1 }
 0x134   : > { %v622_v31 = vpop.f32.mrb[38].mxu0  ;;  %v742_v38 = vpop.f32.mrb[38].mxu1 }
 0x135   : > { %v796_v34 = vmax.f32 %v620_v28, 0.0  ;;  %v623_v35 = vadd.f32 %v2329_v36, %v622_v31  ;;  %v1840_v37 = vpop.f32.mrb[39].mxu0  ;;  %v826_v39 = vmax.f32 %v740_v32, 0.0  ;;  %v743_v40 = vadd.f32 %v2329_v36, %v742_v38  ;;  %v1900_v41 = vpop.f32.mrb[39].mxu1 }
 0x137   : > { %v1725_v42 = vpack.c.bf16 %v796_v34, %v796_v34  ;;  %v797_v43 = vmax.f32 %v623_v35, 0.0  ;;  %v1755_v44 = vpack.c.bf16 %v826_v39, %v826_v39  ;;  %v827_v45 = vmax.f32 %v743_v40, 0.0 }
 0x139   : > { %1087 = vst.msk [vmem:[%s2335_s8 + $0x48] sm:$0xf] %vm1068_vm4, %v1725_v42  ;;  %v1726_v46 = vpack.c.bf16 %v797_v43, %v797_v43  ;;  %1117 = vst.msk [vmem:[%s2335_s8 + $0xc0] sm:$0xf] %vm1068_vm4, %v1755_v44  ;;  %v1756_v47 = vpack.c.bf16 %v827_v45, %v827_v45 }
 0x13a   : > { %v627_v48 = vpop.f32.mrb[40].mxu0  ;;  %v747_v51 = vpop.f32.mrb[40].mxu1 }
 0x13b   : > { %1088 = vst.msk [vmem:[%s2335_s8 + $0x4c] sm:$0xf] %vm1068_vm4, %v1726_v46  ;;  %v628_v49 = vadd.f32 %v2329_v36, %v627_v48  ;;  %v1843_v50 = vpop.f32.mrb[41].mxu0  ;;  %1118 = vst.msk [vmem:[%s2335_s8 + $0xc4] sm:$0xf] %vm1068_vm4, %v1756_v47  ;;  %v748_v53 = vadd.f32 %v2329_v36, %v747_v51  ;;  %v1903_v54 = vpop.f32.mrb[41].mxu1 }
 0x13c   : > { %v630_v52 = vpop.f32.mrb[42].mxu0  ;;  %v750_v58 = vpop.f32.mrb[42].mxu1 }
 0x13d   : > { %v798_v55 = vmax.f32 %v628_v49, 0.0  ;;  %v631_v56 = vadd.f32 %v2329_v36, %v630_v52  ;;  %v1844_v57 = vpop.f32.mrb[43].mxu0  ;;  %v828_v59 = vmax.f32 %v748_v53, 0.0  ;;  %v751_v60 = vadd.f32 %v2329_v36, %v750_v58  ;;  %v1904_v61 = vpop.f32.mrb[43].mxu1 }
 0x13f   : > { %v1727_v62 = vpack.c.bf16 %v798_v55, %v798_v55  ;;  %v799_v63 = vmax.f32 %v631_v56, 0.0  ;;  %v1757_v0 = vpack.c.bf16 %v828_v59, %v828_v59  ;;  %v829_v1 = vmax.f32 %v751_v60, 0.0 }
 0x141   : > { %1089 = vst.msk [vmem:[%s2335_s8 + $0x50] sm:$0xf] %vm1068_vm4, %v1727_v62  ;;  %v1728_v2 = vpack.c.bf16 %v799_v63, %v799_v63  ;;  %1119 = vst.msk [vmem:[%s2335_s8 + $0xc8] sm:$0xf] %vm1068_vm4, %v1757_v0  ;;  %v1758_v3 = vpack.c.bf16 %v829_v1, %v829_v1 }
 0x142   : > { %v635_v4 = vpop.f32.mrb[44].mxu0  ;;  %v755_v7 = vpop.f32.mrb[44].mxu1 }
 0x143   : > { %1090 = vst.msk [vmem:[%s2335_s8 + $0x54] sm:$0xf] %vm1068_vm4, %v1728_v2  ;;  %v636_v5 = vadd.f32 %v2329_v36, %v635_v4  ;;  %v1847_v6 = vpop.f32.mrb[45].mxu0  ;;  %1120 = vst.msk [vmem:[%s2335_s8 + $0xcc] sm:$0xf] %vm1068_vm4, %v1758_v3  ;;  %v756_v9 = vadd.f32 %v2329_v36, %v755_v7  ;;  %v1907_v10 = vpop.f32.mrb[45].mxu1 }
 0x144   : > { %v638_v8 = vpop.f32.mrb[46].mxu0  ;;  %v758_v14 = vpop.f32.mrb[46].mxu1 }
 0x145   : > { %v800_v11 = vmax.f32 %v636_v5, 0.0  ;;  %v639_v12 = vadd.f32 %v2329_v36, %v638_v8  ;;  %v1848_v13 = vpop.f32.mrb[47].mxu0  ;;  %v830_v15 = vmax.f32 %v756_v9, 0.0  ;;  %v759_v16 = vadd.f32 %v2329_v36, %v758_v14  ;;  %v1908_v17 = vpop.f32.mrb[47].mxu1 }
 0x147   : > { %v1729_v18 = vpack.c.bf16 %v800_v11, %v800_v11  ;;  %v801_v19 = vmax.f32 %v639_v12, 0.0  ;;  %v1759_v20 = vpack.c.bf16 %v830_v15, %v830_v15  ;;  %v831_v21 = vmax.f32 %v759_v16, 0.0 }
 0x149   : > { %1091 = vst.msk [vmem:[%s2335_s8 + $0x58] sm:$0xf] %vm1068_vm4, %v1729_v18  ;;  %v1730_v22 = vpack.c.bf16 %v801_v19, %v801_v19  ;;  %1121 = vst.msk [vmem:[%s2335_s8 + $0xd0] sm:$0xf] %vm1068_vm4, %v1759_v20  ;;  %v1760_v23 = vpack.c.bf16 %v831_v21, %v831_v21 }
 0x14a   : > { %v643_v24 = vpop.f32.mrb[48].mxu0  ;;  %v763_v27 = vpop.f32.mrb[48].mxu1 }
 0x14b   : > { %1092 = vst.msk [vmem:[%s2335_s8 + $0x5c] sm:$0xf] %vm1068_vm4, %v1730_v22  ;;  %v644_v25 = vadd.f32 %v2329_v36, %v643_v24  ;;  %v1851_v26 = vpop.f32.mrb[49].mxu0  ;;  %1122 = vst.msk [vmem:[%s2335_s8 + $0xd4] sm:$0xf] %vm1068_vm4, %v1760_v23  ;;  %v764_v29 = vadd.f32 %v2329_v36, %v763_v27  ;;  %v1911_v30 = vpop.f32.mrb[49].mxu1 }
 0x14c   : > { %v646_v28 = vpop.f32.mrb[50].mxu0  ;;  %v766_v34 = vpop.f32.mrb[50].mxu1 }
 0x14d   : > { %v802_v31 = vmax.f32 %v644_v25, 0.0  ;;  %v647_v32 = vadd.f32 %v2329_v36, %v646_v28  ;;  %v1852_v33 = vpop.f32.mrb[51].mxu0  ;;  %v832_v35 = vmax.f32 %v764_v29, 0.0  ;;  %v767_v37 = vadd.f32 %v2329_v36, %v766_v34  ;;  %v1912_v38 = vpop.f32.mrb[51].mxu1 }
 0x14f   : > { %v1731_v39 = vpack.c.bf16 %v802_v31, %v802_v31  ;;  %v803_v40 = vmax.f32 %v647_v32, 0.0  ;;  %v1761_v41 = vpack.c.bf16 %v832_v35, %v832_v35  ;;  %v833_v42 = vmax.f32 %v767_v37, 0.0 }
 0x151   : > { %1093 = vst.msk [vmem:[%s2335_s8 + $0x60] sm:$0xf] %vm1068_vm4, %v1731_v39  ;;  %v1732_v43 = vpack.c.bf16 %v803_v40, %v803_v40  ;;  %1123 = vst.msk [vmem:[%s2335_s8 + $0xd8] sm:$0xf] %vm1068_vm4, %v1761_v41  ;;  %v1762_v44 = vpack.c.bf16 %v833_v42, %v833_v42 }
 0x152   : > { %v651_v45 = vpop.f32.mrb[52].mxu0  ;;  %v771_v48 = vpop.f32.mrb[52].mxu1 }
 0x153   : > { %1094 = vst.msk [vmem:[%s2335_s8 + $0x64] sm:$0xf] %vm1068_vm4, %v1732_v43  ;;  %v652_v46 = vadd.f32 %v2329_v36, %v651_v45  ;;  %v1855_v47 = vpop.f32.mrb[53].mxu0  ;;  %1124 = vst.msk [vmem:[%s2335_s8 + $0xdc] sm:$0xf] %vm1068_vm4, %v1762_v44  ;;  %v772_v50 = vadd.f32 %v2329_v36, %v771_v48  ;;  %v1915_v51 = vpop.f32.mrb[53].mxu1 }
 0x154   : > { %v654_v49 = vpop.f32.mrb[54].mxu0  ;;  %v774_v55 = vpop.f32.mrb[54].mxu1 }
 0x155   : > { %v804_v52 = vmax.f32 %v652_v46, 0.0  ;;  %v655_v53 = vadd.f32 %v2329_v36, %v654_v49  ;;  %v1856_v54 = vpop.f32.mrb[55].mxu0  ;;  %v834_v56 = vmax.f32 %v772_v50, 0.0  ;;  %v775_v57 = vadd.f32 %v2329_v36, %v774_v55  ;;  %v1916_v58 = vpop.f32.mrb[55].mxu1 }
 0x157   : > { %v1733_v59 = vpack.c.bf16 %v804_v52, %v804_v52  ;;  %v805_v60 = vmax.f32 %v655_v53, 0.0  ;;  %v1763_v61 = vpack.c.bf16 %v834_v56, %v834_v56  ;;  %v835_v62 = vmax.f32 %v775_v57, 0.0 }
 0x159   : > { %1095 = vst.msk [vmem:[%s2335_s8 + $0x68] sm:$0xf] %vm1068_vm4, %v1733_v59  ;;  %v1734_v63 = vpack.c.bf16 %v805_v60, %v805_v60  ;;  %1125 = vst.msk [vmem:[%s2335_s8 + $0xe0] sm:$0xf] %vm1068_vm4, %v1763_v61  ;;  %v1764_v0 = vpack.c.bf16 %v835_v62, %v835_v62 }
 0x15a   : > { %v659_v1 = vpop.f32.mrb[56].mxu0 }
 0x15b   : > { %1096 = vst.msk [vmem:[%s2335_s8 + $0x6c] sm:$0xf] %vm1068_vm4, %v1734_v63  ;;  %v660_v2 = vadd.f32 %v2329_v36, %v659_v1  ;;  %v1859_v3 = vpop.f32.mrb[57].mxu0  ;;  %1126 = vst.msk [vmem:[%s2335_s8 + $0xe4] sm:$0xf] %vm1068_vm4, %v1764_v0 }
 0x15c   : > { %v662_v4 = vpop.f32.mrb[58].mxu0 }
 0x15d   : > { %v806_v5 = vmax.f32 %v660_v2, 0.0  ;;  %v663_v6 = vadd.f32 %v2329_v36, %v662_v4  ;;  %v1860_v7 = vpop.f32.mrb[59].mxu0  ;;  %1133 = sbr.rel (!%p2185_p4) target bundleno = 456 (0x1c8), region = 36 }
 0x15f   : > { %v1735_v8 = vpack.c.bf16 %v806_v5, %v806_v5  ;;  %v807_v9 = vmax.f32 %v663_v6, 0.0 }
 0x161   : > { %1097 = vst.msk [vmem:[%s2335_s8 + $0x70] sm:$0xf] %vm1068_vm4, %v1735_v8  ;;  %v1736_v10 = vpack.c.bf16 %v807_v9, %v807_v9 }
 0x163   : > { %1098 = vst.msk [vmem:[%s2335_s8 + $0x74] sm:$0xf] %vm1068_vm4, %v1736_v10 }
 0x164   : > { %s2701_s9 = smov (!%p1136_p8, %s1135_s9), 58 }
 0x165   : > { %s1695_s17 = sshll.u32 %s2701_s9, 6 }
 0x166   : > { %p1698_p9 = scmp.eq.s32.totalorder %s1695_s17, 0 }
 0x167   : > { %2045 = sdivrem.u32 (!%p1698_p9), %s2701_s9, 58 }
 0x168   : > { %1144 = sbr.rel (%p1698_p9) target bundleno = 456 (0x1c8), region = 40 }
 0x170   : > { %s2520_s18 = spop.drf %2045 }
 0x171   : > { %p1699_p10 = scmp.le.s32.totalorder %s2520_s18, 0 }
 0x172   : > { %s2694_s15 = smov (!%p1699_p10), %s2514_s14  ;;  %s2695_s20 = smov (!%p1699_p10), %s2335_s8 }
 0x173   : > { %1527 = sbr.rel (%p1699_p10) target bundleno = 427 (0x1ab), region = 112  ;;  %s2529_s21 = smov (!%p1699_p10), 0  }
 0x174   : > { %s2531_s22 = smov (!%p1699_p10), 0  }
 0x17a LB: >> { %v1161_v36 = vld [vmem:[%s2111_s20] sm:$0xf]  ;;  %v1163_v11 = vld [vmem:[%s2111_s20 + $0x4] sm:$0xf]  ;;  %v1165_v12 = vld [vmem:[%s2111_s20 + $0x8] sm:$0xf]  ;;  %s2119_s22 = sphi %s2531_s22, %s1155_s22   ;;  %s2115_s21 = sphi %s2529_s21, %s2696_s21   ;;  %s2111_s20 = sphi %s2695_s20, %s1282_s20   ;;  %s2107_s15 = sphi %s2694_s15, %s1283_s15  }
 0x17b   : >> { %1162 = vst [vmem:[%s2107_s15] sm:$0xf] %v1161_v36  ;;  %1164 = vst [vmem:[%s2107_s15 + $0x4] sm:$0xf] %v1163_v11  ;;  %v1167_v13 = vld [vmem:[%s2111_s20 + $0xc] sm:$0xf]  ;;  %s1277_s23 = sadd.s32 1, %s2115_s21 }
 0x17c   : >> { %1166 = vst [vmem:[%s2107_s15 + $0x8] sm:$0xf] %v1165_v12  ;;  %v1169_v14 = vld [vmem:[%s2111_s20 + $0x10] sm:$0xf]  ;;  %v1171_v15 = vld [vmem:[%s2111_s20 + $0x14] sm:$0xf]  ;;  %p1278_p11 = scmp.ge.s32.totalorder %s1277_s23, %s2520_s18 }
 0x17d   : >> { %1168 = vst [vmem:[%s2107_s15 + $0xc] sm:$0xf] %v1167_v13  ;;  %1170 = vst [vmem:[%s2107_s15 + $0x10] sm:$0xf] %v1169_v14  ;;  %v1173_v16 = vld [vmem:[%s2111_s20 + $0x18] sm:$0xf] }
 0x17e   : >> { %1172 = vst [vmem:[%s2107_s15 + $0x14] sm:$0xf] %v1171_v15  ;;  %v1175_v17 = vld [vmem:[%s2111_s20 + $0x1c] sm:$0xf]  ;;  %v1177_v18 = vld [vmem:[%s2111_s20 + $0x20] sm:$0xf] }
 0x17f   : >> { %1174 = vst [vmem:[%s2107_s15 + $0x18] sm:$0xf] %v1173_v16  ;;  %1176 = vst [vmem:[%s2107_s15 + $0x1c] sm:$0xf] %v1175_v17  ;;  %v1179_v19 = vld [vmem:[%s2111_s20 + $0x24] sm:$0xf] }
 0x180   : >> { %1178 = vst [vmem:[%s2107_s15 + $0x20] sm:$0xf] %v1177_v18  ;;  %v1181_v20 = vld [vmem:[%s2111_s20 + $0x28] sm:$0xf]  ;;  %v1183_v21 = vld [vmem:[%s2111_s20 + $0x2c] sm:$0xf] }
 0x181   : >> { %1180 = vst [vmem:[%s2107_s15 + $0x24] sm:$0xf] %v1179_v19  ;;  %1182 = vst [vmem:[%s2107_s15 + $0x28] sm:$0xf] %v1181_v20  ;;  %v1185_v22 = vld [vmem:[%s2111_s20 + $0x30] sm:$0xf] }
 0x182   : >> { %1184 = vst [vmem:[%s2107_s15 + $0x2c] sm:$0xf] %v1183_v21  ;;  %v1187_v23 = vld [vmem:[%s2111_s20 + $0x34] sm:$0xf]  ;;  %v1189_v24 = vld [vmem:[%s2111_s20 + $0x38] sm:$0xf] }
 0x183   : >> { %1186 = vst [vmem:[%s2107_s15 + $0x30] sm:$0xf] %v1185_v22  ;;  %1188 = vst [vmem:[%s2107_s15 + $0x34] sm:$0xf] %v1187_v23  ;;  %v1191_v25 = vld [vmem:[%s2111_s20 + $0x3c] sm:$0xf] }
 0x184   : >> { %1190 = vst [vmem:[%s2107_s15 + $0x38] sm:$0xf] %v1189_v24  ;;  %v1193_v26 = vld [vmem:[%s2111_s20 + $0x40] sm:$0xf]  ;;  %v1195_v27 = vld [vmem:[%s2111_s20 + $0x44] sm:$0xf] }
 0x185   : >> { %1192 = vst [vmem:[%s2107_s15 + $0x3c] sm:$0xf] %v1191_v25  ;;  %1194 = vst [vmem:[%s2107_s15 + $0x40] sm:$0xf] %v1193_v26  ;;  %v1197_v28 = vld [vmem:[%s2111_s20 + $0x48] sm:$0xf] }
 0x186   : >> { %1196 = vst [vmem:[%s2107_s15 + $0x44] sm:$0xf] %v1195_v27  ;;  %v1199_v29 = vld [vmem:[%s2111_s20 + $0x4c] sm:$0xf]  ;;  %v1201_v30 = vld [vmem:[%s2111_s20 + $0x50] sm:$0xf] }
 0x187   : >> { %1198 = vst [vmem:[%s2107_s15 + $0x48] sm:$0xf] %v1197_v28  ;;  %1200 = vst [vmem:[%s2107_s15 + $0x4c] sm:$0xf] %v1199_v29  ;;  %v1203_v31 = vld [vmem:[%s2111_s20 + $0x54] sm:$0xf] }
 0x188   : >> { %1202 = vst [vmem:[%s2107_s15 + $0x50] sm:$0xf] %v1201_v30  ;;  %v1205_v32 = vld [vmem:[%s2111_s20 + $0x58] sm:$0xf]  ;;  %v1207_v33 = vld [vmem:[%s2111_s20 + $0x5c] sm:$0xf] }
 0x189   : >> { %1204 = vst [vmem:[%s2107_s15 + $0x54] sm:$0xf] %v1203_v31  ;;  %1206 = vst [vmem:[%s2107_s15 + $0x58] sm:$0xf] %v1205_v32  ;;  %v1209_v34 = vld [vmem:[%s2111_s20 + $0x60] sm:$0xf] }
 0x18a   : >> { %1208 = vst [vmem:[%s2107_s15 + $0x5c] sm:$0xf] %v1207_v33  ;;  %v1211_v35 = vld [vmem:[%s2111_s20 + $0x64] sm:$0xf]  ;;  %v1213_v37 = vld [vmem:[%s2111_s20 + $0x68] sm:$0xf] }
 0x18b   : >> { %1210 = vst [vmem:[%s2107_s15 + $0x60] sm:$0xf] %v1209_v34  ;;  %1212 = vst [vmem:[%s2107_s15 + $0x64] sm:$0xf] %v1211_v35  ;;  %v1215_v38 = vld [vmem:[%s2111_s20 + $0x6c] sm:$0xf] }
 0x18c   : >> { %1214 = vst [vmem:[%s2107_s15 + $0x68] sm:$0xf] %v1213_v37  ;;  %v1217_v39 = vld [vmem:[%s2111_s20 + $0x70] sm:$0xf]  ;;  %v1219_v40 = vld [vmem:[%s2111_s20 + $0x74] sm:$0xf] }
 0x18d   : >> { %1216 = vst [vmem:[%s2107_s15 + $0x6c] sm:$0xf] %v1215_v38  ;;  %1218 = vst [vmem:[%s2107_s15 + $0x70] sm:$0xf] %v1217_v39  ;;  %v1221_v41 = vld [vmem:[%s2111_s20 + $0x78] sm:$0xf] }
 0x18e   : >> { %1220 = vst [vmem:[%s2107_s15 + $0x74] sm:$0xf] %v1219_v40  ;;  %v1223_v42 = vld [vmem:[%s2111_s20 + $0x7c] sm:$0xf]  ;;  %v1225_v43 = vld [vmem:[%s2111_s20 + $0x80] sm:$0xf] }
 0x18f   : >> { %1222 = vst [vmem:[%s2107_s15 + $0x78] sm:$0xf] %v1221_v41  ;;  %1224 = vst [vmem:[%s2107_s15 + $0x7c] sm:$0xf] %v1223_v42  ;;  %v1227_v44 = vld [vmem:[%s2111_s20 + $0x84] sm:$0xf] }
 0x190   : >> { %1226 = vst [vmem:[%s2107_s15 + $0x80] sm:$0xf] %v1225_v43  ;;  %v1229_v45 = vld [vmem:[%s2111_s20 + $0x88] sm:$0xf]  ;;  %v1231_v46 = vld [vmem:[%s2111_s20 + $0x8c] sm:$0xf] }
 0x191   : >> { %1228 = vst [vmem:[%s2107_s15 + $0x84] sm:$0xf] %v1227_v44  ;;  %1230 = vst [vmem:[%s2107_s15 + $0x88] sm:$0xf] %v1229_v45  ;;  %v1233_v47 = vld [vmem:[%s2111_s20 + $0x90] sm:$0xf] }
 0x192   : >> { %1232 = vst [vmem:[%s2107_s15 + $0x8c] sm:$0xf] %v1231_v46  ;;  %v1235_v48 = vld [vmem:[%s2111_s20 + $0x94] sm:$0xf]  ;;  %v1237_v49 = vld [vmem:[%s2111_s20 + $0x98] sm:$0xf] }
 0x193   : >> { %1234 = vst [vmem:[%s2107_s15 + $0x90] sm:$0xf] %v1233_v47  ;;  %1236 = vst [vmem:[%s2107_s15 + $0x94] sm:$0xf] %v1235_v48  ;;  %v1239_v50 = vld [vmem:[%s2111_s20 + $0x9c] sm:$0xf] }
 0x194   : >> { %1238 = vst [vmem:[%s2107_s15 + $0x98] sm:$0xf] %v1237_v49  ;;  %v1241_v51 = vld [vmem:[%s2111_s20 + $0xa0] sm:$0xf]  ;;  %v1243_v52 = vld [vmem:[%s2111_s20 + $0xa4] sm:$0xf] }
 0x195   : >> { %1240 = vst [vmem:[%s2107_s15 + $0x9c] sm:$0xf] %v1239_v50  ;;  %1242 = vst [vmem:[%s2107_s15 + $0xa0] sm:$0xf] %v1241_v51  ;;  %v1245_v53 = vld [vmem:[%s2111_s20 + $0xa8] sm:$0xf] }
 0x196   : >> { %1244 = vst [vmem:[%s2107_s15 + $0xa4] sm:$0xf] %v1243_v52  ;;  %v1247_v54 = vld [vmem:[%s2111_s20 + $0xac] sm:$0xf]  ;;  %v1249_v55 = vld [vmem:[%s2111_s20 + $0xb0] sm:$0xf] }
 0x197   : >> { %1246 = vst [vmem:[%s2107_s15 + $0xa8] sm:$0xf] %v1245_v53  ;;  %1248 = vst [vmem:[%s2107_s15 + $0xac] sm:$0xf] %v1247_v54  ;;  %v1251_v56 = vld [vmem:[%s2111_s20 + $0xb4] sm:$0xf] }
 0x198   : >> { %1250 = vst [vmem:[%s2107_s15 + $0xb0] sm:$0xf] %v1249_v55  ;;  %v1253_v57 = vld [vmem:[%s2111_s20 + $0xb8] sm:$0xf]  ;;  %v1255_v58 = vld [vmem:[%s2111_s20 + $0xbc] sm:$0xf] }
 0x199   : >> { %1252 = vst [vmem:[%s2107_s15 + $0xb4] sm:$0xf] %v1251_v56  ;;  %1254 = vst [vmem:[%s2107_s15 + $0xb8] sm:$0xf] %v1253_v57  ;;  %v1257_v59 = vld [vmem:[%s2111_s20 + $0xc0] sm:$0xf] }
 0x19a   : >> { %1256 = vst [vmem:[%s2107_s15 + $0xbc] sm:$0xf] %v1255_v58  ;;  %v1259_v60 = vld [vmem:[%s2111_s20 + $0xc4] sm:$0xf]  ;;  %v1261_v61 = vld [vmem:[%s2111_s20 + $0xc8] sm:$0xf] }
 0x19b   : >> { %1258 = vst [vmem:[%s2107_s15 + $0xc0] sm:$0xf] %v1257_v59  ;;  %1260 = vst [vmem:[%s2107_s15 + $0xc4] sm:$0xf] %v1259_v60  ;;  %v1263_v62 = vld [vmem:[%s2111_s20 + $0xcc] sm:$0xf] }
 0x19c   : >> { %1262 = vst [vmem:[%s2107_s15 + $0xc8] sm:$0xf] %v1261_v61  ;;  %v1265_v63 = vld [vmem:[%s2111_s20 + $0xd0] sm:$0xf]  ;;  %v1267_v0 = vld [vmem:[%s2111_s20 + $0xd4] sm:$0xf] }
 0x19d   : >> { %1264 = vst [vmem:[%s2107_s15 + $0xcc] sm:$0xf] %v1263_v62  ;;  %1266 = vst [vmem:[%s2107_s15 + $0xd0] sm:$0xf] %v1265_v63  ;;  %v1269_v1 = vld [vmem:[%s2111_s20 + $0xd8] sm:$0xf] }
 0x19e   : >> { %1268 = vst [vmem:[%s2107_s15 + $0xd4] sm:$0xf] %v1267_v0  ;;  %v1271_v2 = vld [vmem:[%s2111_s20 + $0xdc] sm:$0xf]  ;;  %v1273_v3 = vld [vmem:[%s2111_s20 + $0xe0] sm:$0xf] }
 0x19f   : >> { %1270 = vst [vmem:[%s2107_s15 + $0xd8] sm:$0xf] %v1269_v1  ;;  %1272 = vst [vmem:[%s2107_s15 + $0xdc] sm:$0xf] %v1271_v2  ;;  %v1275_v4 = vld [vmem:[%s2111_s20 + $0xe4] sm:$0xf] }
 0x1a0   : >> { %1274 = vst [vmem:[%s2107_s15 + $0xe0] sm:$0xf] %v1273_v3  ;;  %1276 = vst [vmem:[%s2107_s15 + $0xe4] sm:$0xf] %v1275_v4  ;;  %s2703_s23 = smov (%p1278_p11, %s1277_s23), 0  ;;  %s1155_s22 = sadd.s32 1, %s2119_s22  }
 0x1a1   : >> { %s1280_s24 = smul.u32 232, %s2703_s23  ;;  %p1154_p12 = scmp.ge.s32.totalorder %s1155_s22, %s2520_s18 }
 0x1a2   : >> { %s2696_s21 = smov %s2703_s23 }
 0x1a3   : >> { %s1282_s20 = scalar_lea.vmem %s2335_s8, %s1280_s24 [#allocation2]   ;;  %s1283_s15 = scalar_lea.vmem %s2514_s14, %s1280_s24  }
 0x1a4   : > { %1157 = sbr.rel (!%p1154_p12) target bundleno = 378 (0x17a), region = 118 }
 0x1ab PF: > { %2047 = sdivrem.u32 %s2701_s9, 58 }
 0x1ac   : > { %s1700_s25 = smul.u32 232, %s2520_s18 }
 0x1ae   : > { %s1288_s26 = scalar_lea.vmem %s2335_s8, %s1700_s25 [#allocation2]   ;;  %s1290_s27 = scalar_lea.vmem %s2514_s14, %s1700_s25  }
 0x1b4   : > { %s2048_s28 = spop.drf %2047 }
 0x1b5   : > { %p1702_p13 = scmp.le.s32.totalorder %s2048_s28, 0 }
 0x1b6   : > { %s2121_s29 = smov (!%p1702_p13), %s1290_s27   ;;  %s2125_s30 = smov (!%p1702_p13), %s1288_s26  }
 0x1b7   : > { %1541 = sbr.rel (%p1702_p13) target bundleno = 456 (0x1c8), region = 123  ;;  %s2129_s4 = smov (!%p1702_p13), 0  }
 0x1b8   : > { %s2133_s5 = smov (!%p1702_p13), 0  }
 0x1be LB: >> { %v1300_v5 = vld [vmem:[%s2127_s30] sm:$0xf]  ;;  %s1302_s6 = sadd.s32 1, %s2131_s4  ;;  %s1294_s5 = sadd.s32 1, %s2135_s5   ;;  %s2135_s5 = sphi %s2133_s5, %s1294_s5   ;;  %s2131_s4 = sphi %s2129_s4, %s2130_s4   ;;  %s2127_s30 = sphi %s2125_s30, %s1307_s30   ;;  %s2123_s29 = sphi %s2121_s29, %s1308_s29  }
 0x1bf   : >> { %1301 = vst [vmem:[%s2123_s29] sm:$0xf] %v1300_v5  ;;  %p1303_p0 = scmp.ge.s32.totalorder %s1302_s6, %s2048_s28  ;;  %p1293_p1 = scmp.ge.s32.totalorder %s1294_s5, %s2048_s28 }
 0x1c1   : >> { %s2705_s6 = smov (%p1303_p0, %s1302_s6), 0  ;;  %1296 = sbr.rel (!%p1293_p1) target bundleno = 446 (0x1be), region = 129 }
 0x1c2   : >> { %s1703_s7 = sshll.u32 %s2705_s6, 2  ;;  %s2130_s4 = smov %s2705_s6  }
 0x1c3   : >> { %s1307_s30 = scalar_lea.vmem %s1288_s26, %s1703_s7 [#allocation2]   ;;  %s1308_s29 = scalar_lea.vmem %s1290_s27, %s1703_s7  }
 0x1c8 PF: > { %p10_p2 = scmp.ge.s32.totalorder %s2175_s16, 8   ;;  %s2697_s12 = smov %s2099_s13 }
 0x1c9   : > { %s2698_s13 = smov %s2183_s19  ;;  %s2699_s14 = smov %s2175_s16 }
 0x1ca   :  { %12 = sbr.rel (!%p10_p2) target bundleno = 2 (0x2), region = 140 }

</bundles_post_ra>
